<compile_context>
chip_gen: v7x
topology: tpu7x:2x2x1
jax: 0.10.0
libtpu: 0.0.40
codegen_flags: <defaults>
</compile_context>

<pallas_src>
import functools

import jax
import jax.numpy as jnp
from jax.experimental import pallas as pl
from jax.experimental.pallas import tpu as pltpu

_LANES = 128
_ROW_PAD = 16           # sublane rounding: valid for f32 (8) and packed bf16 (16)
_MAX_BLOCK_ROWS = 4096  # 2 MiB f32 per input tile; fits v5e/v6e/v7x scoped VMEM


def _mse_none_kernel(logit_ref, target_ref, loss_ref, *, scale):
    d = logit_ref[...].astype(jnp.float32) - target_ref[...].astype(jnp.float32)
    loss_ref[...] = (d * d * jnp.float32(scale)).astype(loss_ref.dtype)


def _mse_partial_sum_kernel(logit_ref, target_ref, psum_ref, *, scale):
    d = logit_ref[...].astype(jnp.float32) - target_ref[...].astype(jnp.float32)
    loss = d * d * jnp.float32(scale)
    # (block_rows, 128) -> (block_rows/8, 8, 128) is a tile-aligned reshape;
    # summing the leading axis is pure VPU adds (no cross-lane/XLU work).
    br = loss.shape[0]
    psum_ref[...] = loss.reshape(br // 8, 8, _LANES).sum(axis=0)


def _plan(n):
    """Pick (padded_rows, block_rows) for a flat length-n array."""
    rows_raw = pl.cdiv(n, _LANES)
    if rows_raw <= _MAX_BLOCK_ROWS:
        block_rows = ((rows_raw + _ROW_PAD - 1) // _ROW_PAD) * _ROW_PAD
        rows = block_rows
    else:
        block_rows = _MAX_BLOCK_ROWS
        rows = ((rows_raw + block_rows - 1) // block_rows) * block_rows
    return rows, block_rows


def _to_slab(x, rows):
    """Flatten to (rows, 128); zero-pad only the genuine tail (often a no-op)."""
    n = x.size
    padded = rows * _LANES
    flat = x.reshape(-1)
    if padded != n:
        flat = jnp.pad(flat, (0, padded - n))
    return flat.reshape(rows, _LANES)


def mse_loss(logit, target, reduction="mean"):
    assert logit.shape == target.shape, "logit/target shape mismatch"
    orig_shape = logit.shape
    batch_size = orig_shape[0]
    scale = 1.0 / (2.0 * float(batch_size))

    n = logit.size
    rows, block_rows = _plan(n)
    grid = (rows // block_rows,)

    lf = _to_slab(logit, rows)
    tf = _to_slab(target, rows)

    in_specs = [
        pl.BlockSpec((block_rows, _LANES), lambda i: (i, 0)),
        pl.BlockSpec((block_rows, _LANES), lambda i: (i, 0)),
    ]
    params = pltpu.CompilerParams(dimension_semantics=("parallel",))

    if reduction == "none":
        out_dtype = logit.dtype if jnp.issubdtype(logit.dtype, jnp.floating) else jnp.float32
        loss_padded = pl.pallas_call(
            functools.partial(_mse_none_kernel, scale=scale),
            out_shape=jax.ShapeDtypeStruct((rows, _LANES), out_dtype),
            grid_spec=pltpu.PrefetchScalarGridSpec(
                num_scalar_prefetch=0,
                grid=grid,
                in_specs=in_specs,
                out_specs=pl.BlockSpec((block_rows, _LANES), lambda i: (i, 0)),
            ),
            compiler_params=params,
        )(lf, tf)
        if rows * _LANES == n:
            return loss_padded.reshape(orig_shape)
        return loss_padded.reshape(-1)[:n].reshape(orig_shape)

    # 'mean' / 'sum': no full loss writeback, only lane-dense per-block partials.
    partials = pl.pallas_call(
        functools.partial(_mse_partial_sum_kernel, scale=scale),
        out_shape=jax.ShapeDtypeStruct((grid[0] * 8, _LANES), jnp.float32),
        grid_spec=pltpu.PrefetchScalarGridSpec(
            num_scalar_prefetch=0,
            grid=grid,
            in_specs=in_specs,
            out_specs=pl.BlockSpec((8, _LANES), lambda i: (i, 0)),
        ),
        compiler_params=params,
    )(lf, tf)

    total = jnp.sum(partials)  # padded zeros contribute (0-0)^2 = 0
    if reduction == "mean":
        return (total / jnp.float32(n)).astype(jnp.float32)
    return total.astype(jnp.float32)  # 'sum'


def _reference(logit, target, reduction="mean"):
    batch_size = logit.shape[0]
    loss = logit - target
    loss = loss * loss / 2.0 / batch_size
    if reduction == "none":
        return loss
    elif reduction == "mean":
        return loss.mean()
    else:
        return loss.sum()


if __name__ == "__main__":
    key = jax.random.PRNGKey(0)
    k1, k2, k3, k4 = jax.random.split(key, 4)

    # heatmap-style inputs: (batch, channels, H, W) -- padding-free path
    x = jax.random.normal(k1, (2, 4, 16, 16), dtype=jnp.float32)
    y = jax.random.normal(k2, (2, 4, 16, 16), dtype=jnp.float32)

    out_mean = jax.block_until_ready(mse_loss(x, y, reduction="mean"))
    out_sum = jax.block_until_ready(mse_loss(x, y, reduction="sum"))
    out_none = jax.block_until_ready(mse_loss(x, y, reduction="none"))

    ref_mean = _reference(x, y, "mean")
    ref_sum = _reference(x, y, "sum")
    ref_none = _reference(x, y, "none")

    assert jnp.allclose(out_mean, ref_mean, rtol=1e-5, atol=1e-5)
    assert jnp.allclose(out_sum, ref_sum, rtol=1e-5, atol=1e-4)
    assert jnp.allclose(out_none, ref_none, rtol=1e-5, atol=1e-6)

    # odd-sized input -> exercises tail-padding path
    xo = jax.random.normal(k3, (2, 3, 5, 7), dtype=jnp.float32)
    yo = jax.random.normal(k4, (2, 3, 5, 7), dtype=jnp.float32)
    out_mean_o = jax.block_until_ready(mse_loss(xo, yo, reduction="mean"))
    out_none_o = jax.block_until_ready(mse_loss(xo, yo, reduction="none"))
    assert jnp.allclose(out_mean_o, _reference(xo, yo, "mean"), rtol=1e-5, atol=1e-5)
    assert jnp.allclose(out_none_o, _reference(xo, yo, "none"), rtol=1e-5, atol=1e-6)

    # bf16 inputs stay bf16 in HBM, upcast in-kernel
    xb = x.astype(jnp.bfloat16)
    yb = y.astype(jnp.bfloat16)
    out_sum_b = jax.block_until_ready(mse_loss(xb, yb, reduction="sum"))
    ref_sum_b = _reference(xb.astype(jnp.float32), yb.astype(jnp.float32), "sum")
    assert jnp.allclose(out_sum_b, ref_sum_b, rtol=2e-2, atol=2e-2)

    print("KERNEL_OK")
</pallas_src>

<mosaic_0001>
module attributes {stable_mosaic.version = 11 : i64} {
  func.func @_mse_partial_sum_kernel(%arg0: i32, %arg1: memref<16x128xf32, #tpu.memory_space<vmem>>, %arg2: memref<16x128xf32, #tpu.memory_space<vmem>>, %arg3: memref<8x128xf32, #tpu.memory_space<vmem>>) attributes {dimension_semantics = [#tpu.dimension_semantics<parallel>], iteration_bounds = array<i64: 1>, scalar_prefetch = 0 : i64, scratch_operands = 0 : i64, tpu.core_type = #tpu.core_type<tc>, window_params = [{transform_indices = @transform_0, window_bounds = array<i64: 16, 128>}, {transform_indices = @transform_1, window_bounds = array<i64: 16, 128>}, {transform_indices = @transform_2, window_bounds = array<i64: 8, 128>}]} {
    %c0 = arith.constant 0 : index
    %c0_0 = arith.constant 0 : index
    %0 = vector.load %arg1[%c0, %c0_0] : memref<16x128xf32, #tpu.memory_space<vmem>>, vector<16x128xf32>
    %c0_1 = arith.constant 0 : index
    %c0_2 = arith.constant 0 : index
    %1 = vector.load %arg2[%c0_1, %c0_2] : memref<16x128xf32, #tpu.memory_space<vmem>>, vector<16x128xf32>
    %2 = arith.subf %0, %1 : vector<16x128xf32>
    %3 = arith.mulf %2, %2 : vector<16x128xf32>
    %cst = arith.constant 2.500000e-01 : f32
    %4 = vector.broadcast %cst : f32 to vector<16x128xf32>
    %5 = arith.mulf %3, %4 : vector<16x128xf32>
    %6 = vector.shape_cast %5 : vector<16x128xf32> to vector<2x8x128xf32>
    %cst_3 = arith.constant dense<0.000000e+00> : vector<8x128xf32>
    %7 = vector.multi_reduction <add>, %6, %cst_3 [0] : vector<2x8x128xf32> to vector<8x128xf32>
    %c0_4 = arith.constant 0 : index
    %c0_5 = arith.constant 0 : index
    %8 = vector.load %arg3[%c0_4, %c0_5] : memref<8x128xf32, #tpu.memory_space<vmem>>, vector<8x128xf32>
    tpu.vector_store %arg3[%c0_4, %c0_5], %7 {strides = array<i32>} : memref<8x128xf32, #tpu.memory_space<vmem>>, vector<8x128xf32>,
    return
  }
  func.func @transform_0(%arg0: i32) -> (i32, i32) {
    %c0_i32 = arith.constant 0 : i32
    %c0_i32_0 = arith.constant 0 : i32
    return %arg0, %c0_i32 : i32, i32
  }
  func.func @transform_1(%arg0: i32) -> (i32, i32) {
    %c0_i32 = arith.constant 0 : i32
    %c0_i32_0 = arith.constant 0 : i32
    return %arg0, %c0_i32 : i32, i32
  }
  func.func @transform_2(%arg0: i32) -> (i32, i32) {
    %c0_i32 = arith.constant 0 : i32
    %c0_i32_0 = arith.constant 0 : i32
    return %arg0, %c0_i32 : i32, i32
  }
}

</mosaic_0001>

<bundles_post_ra>
// kernel: tpu_custom_call.1
= control target key start
LH: loop header
LB: loop body
LE: loop exit
PB: predicated region body
PF: predicated region fallthrough
CT: control target
= control target key end

     0   :  { %7 = vsyncpa [#allocation3], 0  ;;  %s201_s0 = inlined_call_operand.hbm [shape: f32[16,128], index: 0, kind: input, shape index: {}]   ;;  %s202_s1 = inlined_call_operand.hbm [shape: f32[16,128], index: 1, kind: input, shape index: {}]   ;;  %s203_s2 = inlined_call_operand.hbm [shape: f32[8,128], index: 2, kind: output, shape index: {}]  }
   0x1   :  { %8 = vsyncpa [#allocation6], 0 }
   0x2   :  { %9 = vsyncpa [#allocation4], 0  ;;  %s145_s9 = smov [#allocation2]   ;;  %s73_s13 = scalar_lea.hbm %s201_s0, 256 }
   0x3   :  { %s15_s10 = sshll.u32 %s145_s9, 4  ;;  %p74_p0 = scmp.ne.s32.totalorder %s201_s0, %s73_s13  ;;  %s16_s10 = int_to_ptr.vmem [resolvable:$true] %s15_s10 }
   0x4   :  { %p77_p1 = scmp.lt.u32.totalorder %s73_s13, %s201_s0 }
   0x6   :  { %p79_p2 = pnand %p77_p1, %p74_p0 }
   0x8   :  { %82 = shalt.err (!%p79_p2)
}
   0x9   :  { %s83_s18 = scalar_lea.vmem %s16_s10, 256  ;;  %p88_p4 = scmp.lt.s32.totalorder %s16_s10, %s16_s10 }
   0xa   :  { %p84_p3 = scmp.ne.s32.totalorder %s16_s10, %s83_s18  ;;  %p89_p5 = scmp.lt.s32.totalorder %s83_s18, %s83_s18 }
   0xc   :  { %p90_p6 = por %p89_p5, %p88_p4 }
   0xe   :  { %p91_p7 = pnand %p90_p6, %p84_p3 }
  0x10   :  { %94 = shalt.err (!%p91_p7)
}
  0x11   :  { %s146_s19 = smov 128   ;;  %s147_s20 = smov 8  }
  0x12   :  { %21 = dma.hbm_to_vmem [thread:$0]  %s201_s0, 256, %s16_s10, [#allocation3], %s146_s19, %s146_s19, %s147_s20  }
  0x13   :  { %s148_s23 = smov [#allocation5]   ;;  %s95_s27 = scalar_lea.hbm %s202_s1, 256 }
  0x14   :  { %s27_s24 = sshll.u32 %s148_s23, 4  ;;  %p96_p8 = scmp.ne.s32.totalorder %s202_s1, %s95_s27  ;;  %s28_s24 = int_to_ptr.vmem [resolvable:$true] %s27_s24 }
  0x15   :  { %p99_p9 = scmp.lt.u32.totalorder %s95_s27, %s202_s1 }
  0x17   :  { %p101_p10 = pnand %p99_p9, %p96_p8 }
  0x19   :  { %104 = shalt.err (!%p101_p10)
}
  0x1a   :  { %s105_s4 = scalar_lea.vmem %s28_s24, 256  ;;  %p110_p12 = scmp.lt.s32.totalorder %s28_s24, %s28_s24 }
  0x1b   :  { %p106_p11 = scmp.ne.s32.totalorder %s28_s24, %s105_s4  ;;  %p111_p13 = scmp.lt.s32.totalorder %s105_s4, %s105_s4 }
  0x1d   :  { %p112_p0 = por %p111_p13, %p110_p12 }
  0x1f   :  { %p113_p1 = pnand %p112_p0, %p106_p11 }
  0x21   :  { %116 = shalt.err (!%p113_p1)
}
  0x22   :  { %33 = dma.hbm_to_vmem [thread:$0]  %s202_s1, 256, %s28_s24, [#allocation6], %s146_s19, %s146_s19, %s147_s20  }
  0x23   :  { %139 = dma.done.wait [#allocation3], 256  }
  0x24   :  { %140 = vsyncadd [#allocation3], 4294967040 }
  0x25   :  { %141 = dma.done.wait [#allocation6], 256  }
  0x26   :  { %142 = vsyncadd [#allocation6], 4294967040  ;;  %v40_v0 = vld [vmem:[#allocation2] sm:$0xff]  ;;  %v41_v1 = vld [vmem:[#allocation2 + $0x8] sm:$0xff]  ;;  %s149_s6 = smov [#allocation7]  }
  0x27   :  { %v42_v2 = vld [vmem:[#allocation5] sm:$0xff]  ;;  %v43_v3 = vld [vmem:[#allocation5 + $0x8] sm:$0xff]  ;;  %s58_s7 = sshll.u32 %s149_s6, 4  ;;  %s59_s7 = int_to_ptr.vmem [resolvable:$true] %s58_s7 }
  0x28   :  { %v44_v4 = vsub.f32 %v40_v0, %v42_v2  ;;  %v45_v5 = vsub.f32 %v41_v1, %v43_v3  ;;  %s117_s1 = scalar_lea.vmem %s59_s7, 128  ;;  %p122_p3 = scmp.lt.s32.totalorder %s59_s7, %s59_s7 }
  0x29   :  { %p118_p2 = scmp.ne.s32.totalorder %s59_s7, %s117_s1  ;;  %p123_p4 = scmp.lt.s32.totalorder %s117_s1, %s117_s1 }
  0x2a   :  { %v46_v6 = vmul.f32 %v44_v4, %v44_v4  ;;  %v47_v7 = vmul.f32 %v45_v5, %v45_v5 }
  0x2b   :  { %p124_p5 = por %p123_p4, %p122_p3 }
  0x2c   :  { %v48_v8 = vmul.f32 0.25, %v46_v6  ;;  %v49_v9 = vmul.f32 0.25, %v47_v7 }
  0x2d   :  { %p125_p6 = pnand %p124_p5, %p118_p2 }
  0x2e   :  { %v50_v10 = vadd.f32 %v49_v9, %v48_v8 }
  0x30   :  { %51 = vst [vmem:[#allocation7] sm:$0xff] %v50_v10 }
  0x31   :  { %128 = shalt.err (!%p125_p6)
}
  0x32   :  { %s129_s10 = scalar_lea.hbm %s203_s2, 128 }
  0x33   :  { %p130_p7 = scmp.ne.s32.totalorder %s203_s2, %s129_s10  ;;  %p133_p8 = scmp.lt.u32.totalorder %s129_s10, %s203_s2 }
  0x35   :  { %p135_p9 = pnand %p133_p8, %p130_p7 }
  0x37   :  { %138 = shalt.err (!%p135_p9)
}
  0x38   :  { %61 = dma.vmem_to_hbm [thread:$0]  %s59_s7, 128, %s203_s2, [#allocation4]  }
  0x39   :  { %143 = dma.done.wait [#allocation4], 128  }
  0x3a   :  { %144 = vsyncadd [#allocation4], 4294967168 }
  0x3b   :  { %65 = vsyncpa [#allocation3], 1 }
  0x3c   :  { %66 = vsyncpa [#allocation6], 1 }
  0x3d   :  { %67 = vsyncpa [#allocation4], 1 }

</bundles_post_ra>
